<compile_context>
chip_gen: v7x
topology: tpu7x:2x2x1
jax: 0.10.0
libtpu: 0.0.40
codegen_flags: <defaults>
</compile_context>

<pallas_src>
import functools

import jax
import jax.numpy as jnp
from jax.experimental import pallas as pl
from jax.experimental.pallas import tpu as pltpu


def _cf_matmul_kernel(x_ref, y_ref, o_ref):
    """Single-shot tile matmul: full K resident, write result directly."""
    o_ref[...] = jnp.dot(
        x_ref[...], y_ref[...], preferred_element_type=jnp.float32
    ).astype(o_ref.dtype)


@functools.partial(jax.jit, static_argnames=("tm", "tn"))
def cf_forward(x, y, *, tm=128, tn=256):
    """Compute X @ Y (the CFModel forward pass) with a Pallas TPU kernel.

    K (features) is kept fully resident in every block; only M and N are tiled.
    M / N that are not tile multiples are padded here and sliced on the way out.
    """
    M, K = x.shape
    K2, N = y.shape
    assert K == K2, "inner dims must match"

    # Don't use tiles larger than the (padded) problem.
    tm = min(tm, max(8, ((M + 7) // 8) * 8))
    tn = min(tn, max(128, ((N + 127) // 128) * 128))

    # Pad M / N up to tile multiples (K is never padded -> no contamination).
    Mp = pl.cdiv(M, tm) * tm
    Np = pl.cdiv(N, tn) * tn
    xp = x if Mp == M else jnp.pad(x, ((0, Mp - M), (0, 0)))
    yp = y if Np == N else jnp.pad(y, ((0, 0), (0, Np - N)))

    grid = (Mp // tm, Np // tn)

    out = pl.pallas_call(
        _cf_matmul_kernel,
        out_shape=jax.ShapeDtypeStruct((Mp, Np), jnp.float32),
        grid_spec=pltpu.PrefetchScalarGridSpec(
            num_scalar_prefetch=0,
            grid=grid,
            in_specs=[
                pl.BlockSpec((tm, K), lambda i, j: (i, 0)),  # X tile, full K
                pl.BlockSpec((K, tn), lambda i, j: (0, j)),  # Y tile, full K
            ],
            out_specs=pl.BlockSpec((tm, tn), lambda i, j: (i, j)),
        ),
        compiler_params=pltpu.CompilerParams(
            dimension_semantics=("parallel", "parallel"),
        ),
        cost_estimate=pl.CostEstimate(
            flops=2 * M * N * K,
            bytes_accessed=4 * (M * K + K * N + M * N),
            transcendentals=0,
        ),
    )(xp, yp)

    if Mp != M or Np != N:
        out = out[:M, :N]
    return out


if __name__ == "__main__":
    # Deterministic parameter init matching CFModel.__init__:
    #   X ~ Normal(0, 0.35) of shape (NUM_USER, features)
    #   Y ~ Normal(0, 0.35) of shape (features, NUM_MOVIE)
    NUM_USER, NUM_MOVIE, FEATURES = 128, 256, 64

    key = jax.random.PRNGKey(0)
    kx, ky = jax.random.split(key)
    X = 0.35 * jax.random.normal(kx, (NUM_USER, FEATURES), dtype=jnp.float32)
    Y = 0.35 * jax.random.normal(ky, (FEATURES, NUM_MOVIE), dtype=jnp.float32)

    out = cf_forward(X, Y)
    out = jax.block_until_ready(out)

    # Sanity check against plain JAX matmul.
    ref = X @ Y
    assert out.shape == (NUM_USER, NUM_MOVIE)
    assert jnp.allclose(out, ref, atol=1e-4, rtol=1e-4)

    print("KERNEL_OK")
</pallas_src>

<mosaic_0001>
module attributes {stable_mosaic.version = 11 : i64} {
  func.func @_cf_matmul_kernel(%arg0: i32, %arg1: i32, %arg2: memref<128x64xf32, #tpu.memory_space<vmem>>, %arg3: memref<64x256xf32, #tpu.memory_space<vmem>>, %arg4: memref<128x256xf32, #tpu.memory_space<vmem>>) attributes {dimension_semantics = [#tpu.dimension_semantics<parallel>, #tpu.dimension_semantics<parallel>], iteration_bounds = array<i64: 1, 1>, scalar_prefetch = 0 : i64, scratch_operands = 0 : i64, tpu.core_type = #tpu.core_type<tc>, window_params = [{transform_indices = @transform_0, window_bounds = array<i64: 128, 64>}, {transform_indices = @transform_1, window_bounds = array<i64: 64, 256>}, {transform_indices = @transform_2, window_bounds = array<i64: 128, 256>}]} {
    %c0 = arith.constant 0 : index
    %c0_0 = arith.constant 0 : index
    %0 = vector.load %arg2[%c0, %c0_0] : memref<128x64xf32, #tpu.memory_space<vmem>>, vector<128x64xf32>
    %c0_1 = arith.constant 0 : index
    %c0_2 = arith.constant 0 : index
    %1 = vector.load %arg3[%c0_1, %c0_2] : memref<64x256xf32, #tpu.memory_space<vmem>>, vector<64x256xf32>
    %cst = arith.constant dense<0.000000e+00> : vector<128x256xf32>
    %2 = tpu.matmul %0, %1, %cst {dimension_numbers = #tpu.dot_dimension_numbers<[1], [0], [0], [1], [0, 0, 1, 1], [], []>} : vector<128x64xf32>, vector<64x256xf32>, vector<128x256xf32> -> vector<128x256xf32>
    %c0_3 = arith.constant 0 : index
    %c0_4 = arith.constant 0 : index
    %3 = vector.load %arg4[%c0_3, %c0_4] : memref<128x256xf32, #tpu.memory_space<vmem>>, vector<128x256xf32>
    tpu.vector_store %arg4[%c0_3, %c0_4], %2 {strides = array<i32>} : memref<128x256xf32, #tpu.memory_space<vmem>>, vector<128x256xf32>,
    return
  }
  func.func @transform_0(%arg0: i32, %arg1: i32) -> (i32, i32) {
    %c0_i32 = arith.constant 0 : i32
    %c0_i32_0 = arith.constant 0 : i32
    return %arg0, %c0_i32 : i32, i32
  }
  func.func @transform_1(%arg0: i32, %arg1: i32) -> (i32, i32) {
    %c0_i32 = arith.constant 0 : i32
    %c0_i32_0 = arith.constant 0 : i32
    return %c0_i32, %arg1 : i32, i32
  }
  func.func @transform_2(%arg0: i32, %arg1: i32) -> (i32, i32) {
    %c0_i32 = arith.constant 0 : i32
    return %arg0, %arg1 : i32, i32
  }
}

</mosaic_0001>

<bundles_post_ra>
// kernel: cf_forward.1
= control target key start
LH: loop header
LB: loop body
LE: loop exit
PB: predicated region body
PF: predicated region fallthrough
CT: control target
= control target key end

     0   :  { %v370_v7 = vmov 0.0   ;;  %s529_s0 = inlined_call_operand.vmem [shape: f32[128,64], index: 0, kind: input, shape index: {}]   ;;  %s530_s1 = inlined_call_operand.vmem [shape: f32[64,256], index: 1, kind: input, shape index: {}]   ;;  %s531_s2 = inlined_call_operand.hbm [shape: f32[128,256], index: 2, kind: output, shape index: {}]  }
   0x1   :  { %v29_v0 = vld [vmem:[%s530_s1 + $0x8] sm:$0xff]  ;;  %v31_v1 = vld [vmem:[%s530_s1 + $0x18] sm:$0xff]  ;;  %v28_v2 = vld [vmem:[%s530_s1] sm:$0xff]  ;;  %157 = vmatprep.mubr.f32.mxu0 %v370_v7  ;;  %205 = vmatprep.mubr.f32.mxu1 %v370_v7 }
   0x2   :  { %v318_v3 = vpack.c.bf16 %v31_v1, %v29_v0  ;;  %v30_v4 = vld [vmem:[%s530_s1 + $0x10] sm:$0xff]  ;;  %v33_v5 = vld [vmem:[%s530_s1 + $0x28] sm:$0xff]  ;;  %v35_v6 = vld [vmem:[%s530_s1 + $0x38] sm:$0xff] }
   0x3   :  { %v320_v8 = vpack.c.bf16 %v30_v4, %v28_v2  ;;  %v322_v9 = vpack.c.bf16 %v35_v6, %v33_v5  ;;  %v32_v10 = vld [vmem:[%s530_s1 + $0x20] sm:$0xff]  ;;  %v34_v11 = vld [vmem:[%s530_s1 + $0x30] sm:$0xff]  ;;  %v37_v12 = vld [vmem:[%s530_s1 + $0x48] sm:$0xff] }
   0x4   :  { %319 = vmatprep.subr.bf16.mxu0 %v318_v3  ;;  %334 = vmatprep.subr.bf16.mxu1 %v318_v3  ;;  %v39_v13 = vld [vmem:[%s530_s1 + $0x58] sm:$0xff]  ;;  %v324_v14 = vpack.c.bf16 %v34_v11, %v32_v10  ;;  %v36_v16 = vld [vmem:[%s530_s1 + $0x40] sm:$0xff]  ;;  %v38_v17 = vld [vmem:[%s530_s1 + $0x50] sm:$0xff] }
   0x5   :  { %321 = vmatpush1.bf16.msra.mxu0 %v320_v8  ;;  %338 = vmatpush1.bf16.msra.mxu1 %v320_v8  ;;  %v326_v15 = vpack.c.bf16 %v39_v13, %v37_v12  ;;  %v41_v18 = vld [vmem:[%s530_s1 + $0x68] sm:$0xff]  ;;  %v43_v19 = vld [vmem:[%s530_s1 + $0x78] sm:$0xff]  ;;  %v328_v20 = vpack.c.bf16 %v38_v17, %v36_v16  ;;  %v40_v22 = vld [vmem:[%s530_s1 + $0x60] sm:$0xff] }
   0x6   :  { %323 = vmatprep.subr.bf16.mxu0 %v322_v9  ;;  %335 = vmatprep.subr.bf16.mxu1 %v322_v9  ;;  %v330_v21 = vpack.c.bf16 %v43_v19, %v41_v18  ;;  %v42_v23 = vld [vmem:[%s530_s1 + $0x70] sm:$0xff] }
   0x9   :  { %325 = vmatpush1.bf16.msra.mxu0 %v324_v14  ;;  %339 = vmatpush1.bf16.msra.mxu1 %v324_v14 }
   0xa   :  { %327 = vmatprep.subr.bf16.mxu0 %v326_v15  ;;  %336 = vmatprep.subr.bf16.mxu1 %v326_v15 }
   0xb   :  { %7 = vsyncpa [#allocation3], 0  ;;  %v332_v24 = vpack.c.bf16 %v42_v23, %v40_v22  ;;  %v12_v25 = vld [vmem:[%s529_s0] sm:$0xff]  ;;  %vm44_vm0 = vcmask 523264   ;;  %v13_v27 = vld [vmem:[%s529_s0 + $0x8] sm:$0xff] }
   0xc   :  { %v20_v26 = vld [vmem:[%s529_s0 + $0x40] sm:$0xff]  ;;  %v21_v28 = vld [vmem:[%s529_s0 + $0x48] sm:$0xff]  ;;  %v14_v29 = vld [vmem:[%s529_s0 + $0x10] sm:$0xff] }
   0xd   :  { %329 = vmatpush1.bf16.msra.mxu0 %v328_v20  ;;  %340 = vmatpush1.bf16.msra.mxu1 %v328_v20  ;;  %v22_v30 = vld [vmem:[%s529_s0 + $0x50] sm:$0xff]  ;;  %v15_v31 = vld [vmem:[%s529_s0 + $0x18] sm:$0xff]  ;;  %v16_v33 = vld [vmem:[%s529_s0 + $0x20] sm:$0xff] }
   0xe   :  { %331 = vmatprep.subr.bf16.mxu0 %v330_v21  ;;  %337 = vmatprep.subr.bf16.mxu1 %v330_v21  ;;  %v23_v32 = vld [vmem:[%s529_s0 + $0x58] sm:$0xff]  ;;  %v24_v34 = vld [vmem:[%s529_s0 + $0x60] sm:$0xff]  ;;  %v17_v35 = vld [vmem:[%s529_s0 + $0x28] sm:$0xff] }
   0xf   :  { %v25_v36 = vld [vmem:[%s529_s0 + $0x68] sm:$0xff]  ;;  %v18_v37 = vld [vmem:[%s529_s0 + $0x30] sm:$0xff]  ;;  %v19_v39 = vld [vmem:[%s529_s0 + $0x38] sm:$0xff] }
  0x10   :  { %v26_v38 = vld [vmem:[%s529_s0 + $0x70] sm:$0xff]  ;;  %v27_v40 = vld [vmem:[%s529_s0 + $0x78] sm:$0xff]  ;;  %s371_s0 = smov [#allocation2]  }
  0x11   :  { %333 = vmatpush1.bf16.msra.mxu0 %v332_v24  ;;  %341 = vmatpush1.bf16.msra.mxu1 %v332_v24  ;;  %s291_s16 = sshll.u32 %s371_s0, 4  ;;  %s292_s16 = int_to_ptr.vmem [resolvable:$true] %s291_s16 }
  0x12   :  { %s346_s1 = scalar_lea.vmem %s292_s16, 4096  ;;  %p351_p1 = scmp.lt.s32.totalorder %s292_s16, %s292_s16 }
  0x13   :  { %p347_p0 = scmp.ne.s32.totalorder %s292_s16, %s346_s1  ;;  %p352_p2 = scmp.lt.s32.totalorder %s346_s1, %s346_s1 }
  0x14   :  { %302 = vmatmul.mubr.msk.f32.vlgmr.msra.gmra.mrb[0].mxu0 %vm44_vm0, %v12_v25  ;;  %310 = vmatmul.mubr.msk.f32.vlgmr.msra.gmra.mrb[0].mxu1 %vm44_vm0, %v20_v26 }
  0x15   :  { %163 = vmatprep.mubr.f32.mxu0 %v370_v7  ;;  %211 = vmatprep.mubr.f32.mxu1 %v370_v7  ;;  %p353_p3 = por %p352_p2, %p351_p1 }
  0x17   :  { %p354_p4 = pnand %p353_p3, %p347_p0 }
  0x18   :  { %303 = vmatmul.mubr.msk.f32.gmra.mrb[2].mxu0 %vm44_vm0, %v13_v27  ;;  %311 = vmatmul.mubr.msk.f32.gmra.mrb[2].mxu1 %vm44_vm0, %v21_v28 }
  0x19   :  { %169 = vmatprep.mubr.f32.mxu0 %v370_v7  ;;  %217 = vmatprep.mubr.f32.mxu1 %v370_v7 }
  0x1c   :  { %304 = vmatmul.mubr.msk.f32.gmra.mrb[4].mxu0 %vm44_vm0, %v14_v29  ;;  %312 = vmatmul.mubr.msk.f32.gmra.mrb[4].mxu1 %vm44_vm0, %v22_v30 }
  0x1d   :  { %175 = vmatprep.mubr.f32.mxu0 %v370_v7  ;;  %223 = vmatprep.mubr.f32.mxu1 %v370_v7 }
  0x20   :  { %305 = vmatmul.mubr.msk.f32.gmra.mrb[6].mxu0 %vm44_vm0, %v15_v31  ;;  %313 = vmatmul.mubr.msk.f32.gmra.mrb[6].mxu1 %vm44_vm0, %v23_v32 }
  0x21   :  { %181 = vmatprep.mubr.f32.mxu0 %v370_v7  ;;  %229 = vmatprep.mubr.f32.mxu1 %v370_v7 }
  0x24   :  { %306 = vmatmul.mubr.msk.f32.gmra.mrb[8].mxu0 %vm44_vm0, %v16_v33  ;;  %314 = vmatmul.mubr.msk.f32.gmra.mrb[8].mxu1 %vm44_vm0, %v24_v34 }
  0x25   :  { %187 = vmatprep.mubr.f32.mxu0 %v370_v7  ;;  %235 = vmatprep.mubr.f32.mxu1 %v370_v7 }
  0x28   :  { %307 = vmatmul.mubr.msk.f32.gmra.mrb[10].mxu0 %vm44_vm0, %v17_v35  ;;  %315 = vmatmul.mubr.msk.f32.gmra.mrb[10].mxu1 %vm44_vm0, %v25_v36 }
  0x29   :  { %193 = vmatprep.mubr.f32.mxu0 %v370_v7  ;;  %241 = vmatprep.mubr.f32.mxu1 %v370_v7 }
  0x2c   :  { %308 = vmatmul.mubr.msk.f32.gmra.mrb[12].mxu0 %vm44_vm0, %v18_v37  ;;  %316 = vmatmul.mubr.msk.f32.gmra.mrb[12].mxu1 %vm44_vm0, %v26_v38 }
  0x2d   :  { %199 = vmatprep.mubr.f32.mxu0 %v370_v7  ;;  %247 = vmatprep.mubr.f32.mxu1 %v370_v7 }
  0x30   :  { %309 = vmatmul.mubr.msk.f32.gmra.mrb[14].mxu0 %vm44_vm0, %v19_v39  ;;  %317 = vmatmul.mubr.msk.f32.gmra.mrb[14].mxu1 %vm44_vm0, %v27_v40 }
  0xe7   :  { %v159_v41 = vpop.f32.mrb[0].mxu0  ;;  %v207_v42 = vpop.f32.mrb[0].mxu1 }
  0xe8   :  { %254 = vst [vmem:[#allocation2] sm:$0xff] %v159_v41  ;;  %270 = vst [vmem:[#allocation2 + $0x80] sm:$0xff] %v207_v42  ;;  %v161_v43 = vpop.f32.mrb[1].mxu0  ;;  %v209_v44 = vpop.f32.mrb[1].mxu1 }
  0xe9   :  { %255 = vst [vmem:[#allocation2 + $0x8] sm:$0xff] %v161_v43  ;;  %271 = vst [vmem:[#allocation2 + $0x88] sm:$0xff] %v209_v44 }
  0xeb   :  { %v165_v45 = vpop.f32.mrb[2].mxu0  ;;  %v213_v46 = vpop.f32.mrb[2].mxu1 }
  0xec   :  { %256 = vst [vmem:[#allocation2 + $0x10] sm:$0xff] %v165_v45  ;;  %272 = vst [vmem:[#allocation2 + $0x90] sm:$0xff] %v213_v46  ;;  %v167_v47 = vpop.f32.mrb[3].mxu0  ;;  %v215_v48 = vpop.f32.mrb[3].mxu1 }
  0xed   :  { %257 = vst [vmem:[#allocation2 + $0x18] sm:$0xff] %v167_v47  ;;  %273 = vst [vmem:[#allocation2 + $0x98] sm:$0xff] %v215_v48 }
  0xef   :  { %v171_v49 = vpop.f32.mrb[4].mxu0  ;;  %v219_v50 = vpop.f32.mrb[4].mxu1 }
  0xf0   :  { %258 = vst [vmem:[#allocation2 + $0x20] sm:$0xff] %v171_v49  ;;  %274 = vst [vmem:[#allocation2 + $0xa0] sm:$0xff] %v219_v50  ;;  %v173_v51 = vpop.f32.mrb[5].mxu0  ;;  %v221_v52 = vpop.f32.mrb[5].mxu1 }
  0xf1   :  { %259 = vst [vmem:[#allocation2 + $0x28] sm:$0xff] %v173_v51  ;;  %275 = vst [vmem:[#allocation2 + $0xa8] sm:$0xff] %v221_v52 }
  0xf3   :  { %v177_v53 = vpop.f32.mrb[6].mxu0  ;;  %v225_v54 = vpop.f32.mrb[6].mxu1 }
  0xf4   :  { %260 = vst [vmem:[#allocation2 + $0x30] sm:$0xff] %v177_v53  ;;  %276 = vst [vmem:[#allocation2 + $0xb0] sm:$0xff] %v225_v54  ;;  %v179_v55 = vpop.f32.mrb[7].mxu0  ;;  %v227_v56 = vpop.f32.mrb[7].mxu1 }
  0xf5   :  { %261 = vst [vmem:[#allocation2 + $0x38] sm:$0xff] %v179_v55  ;;  %277 = vst [vmem:[#allocation2 + $0xb8] sm:$0xff] %v227_v56 }
  0xf7   :  { %v183_v57 = vpop.f32.mrb[8].mxu0  ;;  %v231_v58 = vpop.f32.mrb[8].mxu1 }
  0xf8   :  { %262 = vst [vmem:[#allocation2 + $0x40] sm:$0xff] %v183_v57  ;;  %278 = vst [vmem:[#allocation2 + $0xc0] sm:$0xff] %v231_v58  ;;  %v185_v59 = vpop.f32.mrb[9].mxu0  ;;  %v233_v60 = vpop.f32.mrb[9].mxu1 }
  0xf9   :  { %263 = vst [vmem:[#allocation2 + $0x48] sm:$0xff] %v185_v59  ;;  %279 = vst [vmem:[#allocation2 + $0xc8] sm:$0xff] %v233_v60 }
  0xfb   :  { %v189_v61 = vpop.f32.mrb[10].mxu0  ;;  %v237_v62 = vpop.f32.mrb[10].mxu1 }
  0xfc   :  { %264 = vst [vmem:[#allocation2 + $0x50] sm:$0xff] %v189_v61  ;;  %280 = vst [vmem:[#allocation2 + $0xd0] sm:$0xff] %v237_v62  ;;  %v191_v63 = vpop.f32.mrb[11].mxu0  ;;  %v239_v0 = vpop.f32.mrb[11].mxu1 }
  0xfd   :  { %265 = vst [vmem:[#allocation2 + $0x58] sm:$0xff] %v191_v63  ;;  %281 = vst [vmem:[#allocation2 + $0xd8] sm:$0xff] %v239_v0 }
  0xff   :  { %v195_v1 = vpop.f32.mrb[12].mxu0  ;;  %v243_v2 = vpop.f32.mrb[12].mxu1 }
 0x100   :  { %266 = vst [vmem:[#allocation2 + $0x60] sm:$0xff] %v195_v1  ;;  %282 = vst [vmem:[#allocation2 + $0xe0] sm:$0xff] %v243_v2  ;;  %v197_v3 = vpop.f32.mrb[13].mxu0  ;;  %v245_v4 = vpop.f32.mrb[13].mxu1 }
 0x101   :  { %267 = vst [vmem:[#allocation2 + $0x68] sm:$0xff] %v197_v3  ;;  %283 = vst [vmem:[#allocation2 + $0xe8] sm:$0xff] %v245_v4 }
 0x103   :  { %v201_v5 = vpop.f32.mrb[14].mxu0  ;;  %v249_v6 = vpop.f32.mrb[14].mxu1 }
 0x104   :  { %268 = vst [vmem:[#allocation2 + $0x70] sm:$0xff] %v201_v5  ;;  %284 = vst [vmem:[#allocation2 + $0xf0] sm:$0xff] %v249_v6  ;;  %v203_v7 = vpop.f32.mrb[15].mxu0  ;;  %v251_v8 = vpop.f32.mrb[15].mxu1 }
 0x105   :  { %269 = vst [vmem:[#allocation2 + $0x78] sm:$0xff] %v203_v7  ;;  %285 = vst [vmem:[#allocation2 + $0xf8] sm:$0xff] %v251_v8 }
 0x106   :  { %357 = shalt.err (!%p354_p4)
}
 0x107   :  { %s358_s19 = scalar_lea.hbm %s531_s2, 4096 }
 0x108   :  { %p359_p5 = scmp.ne.s32.totalorder %s531_s2, %s358_s19  ;;  %p362_p6 = scmp.lt.u32.totalorder %s358_s19, %s531_s2 }
 0x10a   :  { %p364_p7 = pnand %p362_p6, %p359_p5 }
 0x10c   :  { %367 = shalt.err (!%p364_p7)
}
 0x10d   :  { %s372_s24 = smov 256   ;;  %s373_s25 = smov 16  }
 0x10e   :  { %297 = dma.vmem_to_hbm [thread:$0]  %s292_s16, 4096, %s531_s2, [#allocation3], %s372_s24, %s372_s24, %s373_s25  }
 0x10f   :  { %368 = dma.done.wait [#allocation3], 4096  }
 0x110   :  { %369 = vsyncadd [#allocation3], 4294963200 }
 0x111   :  { %301 = vsyncpa [#allocation3], 1 }

</bundles_post_ra>
